<compile_context>
chip_gen: v5e
topology: v5e:2x2
jax: 0.10.0
libtpu: 0.0.40
codegen_flags: <defaults>
</compile_context>

<pallas_src>
import jax
import jax.numpy as jnp
from jax import lax
from jax.experimental import pallas as pl
from jax.experimental.pallas import tpu as pltpu


def _round_up(x, m):
    return (x + m - 1) // m * m


def critic_kernel(s_ref, a_ref, ws_ref, wa_ref, p_ref, bc_ref, out_ref):
    # s_ref : (TB, S)   state batch tile, natural (batch-major) layout
    # a_ref : (TB, A)   action batch tile
    # ws_ref: (Hp, S)   fc_state weight   (VMEM-resident, torch (out, in) layout)
    # wa_ref: (Hp, A)   fc_action weight  (VMEM-resident)
    # p_ref : (Hp, 4)   packed columns [bs, ba, wc_state, wc_action] (resident)
    # bc_ref: (1,) SMEM scalar combined-layer bias
    # out_ref: (1, TB)  lane-dense q row for this batch tile
    dn = (((1,), (1,)), ((), ()))  # contract last dims: (Hp,K)x(TB,K) -> (Hp,TB)
    hs = lax.dot_general(ws_ref[...], s_ref[...], dn,
                         preferred_element_type=jnp.float32)
    ha = lax.dot_general(wa_ref[...], a_ref[...], dn,
                         preferred_element_type=jnp.float32)
    hs = jnp.maximum(hs + p_ref[:, 0:1], 0.0)          # relu(fc_state)
    ha = jnp.maximum(ha + p_ref[:, 1:2], 0.0)          # relu(fc_action)
    # Output layer (out_features = 1): VPU multiply + sublane reduction,
    # no degenerate N=1 MXU matmul.
    q = jnp.sum(hs * p_ref[:, 2:3] + ha * p_ref[:, 3:4],
                axis=0, keepdims=True) + bc_ref[0]
    out_ref[...] = q.astype(out_ref.dtype)


def _choose_tiling(B, Hp):
    """Pick (num_tiles, block_b).

    Single full-batch tile for small/medium B (grid steps are pure overhead on
    single-TC v5e/v6e); otherwise an even number of 128-aligned tiles so v7x's
    two TensorCores are balanced.  Cap tile width when Hp is large so the two
    (Hp, TB) f32 activations stay within vreg/VMEM comfort.
    """
    max_tile = 512 if Hp > 64 else 1024
    if B <= 512:
        return 1, B
    n = 2
    while pl.cdiv(B, n) > max_tile:
        n += 2
    block_b = _round_up(pl.cdiv(B, n), 128)
    return pl.cdiv(B, block_b), block_b


def critic_forward(state, action, packed):
    """state: (B, S) f32, action: (B, A) f32 -> q, matching torch .squeeze()."""
    B, S = state.shape
    A = action.shape[1]
    Hp = packed["ws"].shape[0]

    num_tiles, block_b = _choose_tiling(B, Hp)
    B_pad = num_tiles * block_b   # output-side only; inputs are NOT padded

    out = pl.pallas_call(
        critic_kernel,
        grid=(num_tiles,),
        out_shape=jax.ShapeDtypeStruct((1, B_pad), jnp.float32),
        in_specs=[
            pl.BlockSpec((block_b, S), lambda i: (i, 0)),        # state tile
            pl.BlockSpec((block_b, A), lambda i: (i, 0)),        # action tile
            pl.BlockSpec((Hp, S), lambda i: (0, 0)),             # resident Ws
            pl.BlockSpec((Hp, A), lambda i: (0, 0)),             # resident Wa
            pl.BlockSpec((Hp, 4), lambda i: (0, 0)),             # resident biases+wc
            pl.BlockSpec(memory_space=pltpu.MemorySpace.SMEM),   # scalar out bias
        ],
        out_specs=pl.BlockSpec((1, block_b), lambda i: (0, i)),
        compiler_params=pltpu.CompilerParams(
            dimension_semantics=("parallel",)),
    )(state.astype(jnp.float32), action.astype(jnp.float32),
      packed["ws"], packed["wa"], packed["p"], packed["bc"])

    return jnp.squeeze(out[0, :B])   # matches torch .squeeze()


def init_params(key, state_dim, action_dim, hidden_dim=128):
    """Raw torch-layout params: weight (out, in), bias (out,), U(-1/sqrt(fan_in), +)."""
    ks = jax.random.split(key, 6)

    def lin(kw, kb, fan_in, fan_out):
        bound = 1.0 / jnp.sqrt(jnp.float32(fan_in))
        w = jax.random.uniform(kw, (fan_out, fan_in), jnp.float32, -bound, bound)
        b = jax.random.uniform(kb, (fan_out,), jnp.float32, -bound, bound)
        return w, b

    ws, bs = lin(ks[0], ks[1], state_dim, hidden_dim)
    wa, ba = lin(ks[2], ks[3], action_dim, hidden_dim)
    wc, bc = lin(ks[4], ks[5], 2 * hidden_dim, 1)
    return {"ws": ws, "bs": bs, "wa": wa, "ba": ba, "wc": wc, "bc": bc}


def pack_params(raw):
    """Pack torch-layout params into the kernel layout (zero-padded to whole sublanes)."""
    H, S = raw["ws"].shape
    A = raw["wa"].shape[1]
    Hp = _round_up(H, 8)   # pad hidden dim to whole sublanes (exact zeros)

    ws = jnp.zeros((Hp, S), jnp.float32).at[:H, :].set(raw["ws"])
    wa = jnp.zeros((Hp, A), jnp.float32).at[:H, :].set(raw["wa"])

    p = jnp.zeros((Hp, 4), jnp.float32)
    p = p.at[:H, 0].set(raw["bs"])
    p = p.at[:H, 1].set(raw["ba"])
    p = p.at[:H, 2].set(raw["wc"][0, :H])    # wc half acting on x_state
    p = p.at[:H, 3].set(raw["wc"][0, H:])    # wc half acting on x_action

    bc = raw["bc"].reshape(1).astype(jnp.float32)   # scalar bias -> SMEM
    return {"ws": ws, "wa": wa, "p": p, "bc": bc}


def reference_forward(state, action, raw):
    """Pure-JAX reference matching the PyTorch module exactly."""
    h_s = jnp.maximum(state @ raw["ws"].T + raw["bs"], 0.0)
    h_a = jnp.maximum(action @ raw["wa"].T + raw["ba"], 0.0)
    x = jnp.concatenate([h_s, h_a], axis=1)
    return jnp.squeeze(x @ raw["wc"].T + raw["bc"])


if __name__ == "__main__":
    # MountainCarContinuous-like dims: state_dim=2, action_dim=1; small hidden.
    state_dim, action_dim, hidden_dim = 2, 1, 32

    key = jax.random.PRNGKey(0)
    k_p, k_s, k_a, k_s2, k_a2 = jax.random.split(key, 5)
    raw = init_params(k_p, state_dim, action_dim, hidden_dim)
    packed = pack_params(raw)

    # Small batch (single full-batch tile, block == full dims).
    B = 8
    state = jax.random.normal(k_s, (B, state_dim), jnp.float32)
    action = jax.random.normal(k_a, (B, action_dim), jnp.float32)
    q = jax.block_until_ready(critic_forward(state, action, packed))
    q_ref = reference_forward(state, action, raw)
    assert q.shape == (B,), q.shape
    assert jnp.allclose(q, q_ref, atol=1e-5, rtol=1e-5), (q, q_ref)

    # Larger batch exercising the parallel grid (2 balanced tiles of 640) with a
    # partial input edge block (1200 is not a multiple of 640).
    B2 = 1200
    state2 = jax.random.normal(k_s2, (B2, state_dim), jnp.float32)
    action2 = jax.random.normal(k_a2, (B2, action_dim), jnp.float32)
    q2 = jax.block_until_ready(critic_forward(state2, action2, packed))
    q2_ref = reference_forward(state2, action2, raw)
    assert q2.shape == (B2,), q2.shape
    assert jnp.allclose(q2, q2_ref, atol=1e-5, rtol=1e-5), "tiled-grid mismatch"

    print("KERNEL_OK")
</pallas_src>

<mosaic_0001>
module attributes {stable_mosaic.version = 11 : i64} {
  func.func @critic_kernel(%arg0: i32, %arg1: memref<8x2xf32, #tpu.memory_space<vmem>>, %arg2: memref<8x1xf32, #tpu.memory_space<vmem>>, %arg3: memref<32x2xf32, #tpu.memory_space<vmem>>, %arg4: memref<32x1xf32, #tpu.memory_space<vmem>>, %arg5: memref<32x4xf32, #tpu.memory_space<vmem>>, %arg6: memref<1xf32, #tpu.memory_space<smem>>, %arg7: memref<1x8xf32, #tpu.memory_space<vmem>>) attributes {dimension_semantics = [#tpu.dimension_semantics<parallel>], iteration_bounds = array<i64: 1>, scalar_prefetch = 0 : i64, scratch_operands = 0 : i64, tpu.core_type = #tpu.core_type<tc>, window_params = [{transform_indices = @transform_0, window_bounds = array<i64: 8, 2>}, {transform_indices = @transform_1, window_bounds = array<i64: 8, 1>}, {pipeline_mode = #tpu.pipeline_mode<synchronous>, transform_indices = @transform_2, window_bounds = array<i64: 32, 2>}, {pipeline_mode = #tpu.pipeline_mode<synchronous>, transform_indices = @transform_3, window_bounds = array<i64: 32, 1>}, {pipeline_mode = #tpu.pipeline_mode<synchronous>, transform_indices = @transform_4, window_bounds = array<i64: 32, 4>}, {transform_indices = @transform_5, window_bounds = array<i64: 1>}, {transform_indices = @transform_6, window_bounds = array<i64: 1, 8>}]} {
    %c0 = arith.constant 0 : index
    %c0_0 = arith.constant 0 : index
    %0 = vector.load %arg3[%c0, %c0_0] : memref<32x2xf32, #tpu.memory_space<vmem>>, vector<32x2xf32>
    %c0_1 = arith.constant 0 : index
    %c0_2 = arith.constant 0 : index
    %1 = vector.load %arg1[%c0_1, %c0_2] : memref<8x2xf32, #tpu.memory_space<vmem>>, vector<8x2xf32>
    %cst = arith.constant dense<0.000000e+00> : vector<32x8xf32>
    %2 = tpu.matmul %0, %1, %cst {dimension_numbers = #tpu.dot_dimension_numbers<[1], [1], [0], [0], [0, 0, 1, 0], [], []>} : vector<32x2xf32>, vector<8x2xf32>, vector<32x8xf32> -> vector<32x8xf32>
    %c0_3 = arith.constant 0 : index
    %c0_4 = arith.constant 0 : index
    %3 = vector.load %arg4[%c0_3, %c0_4] : memref<32x1xf32, #tpu.memory_space<vmem>>, vector<32x1xf32>
    %c0_5 = arith.constant 0 : index
    %c0_6 = arith.constant 0 : index
    %4 = vector.load %arg2[%c0_5, %c0_6] : memref<8x1xf32, #tpu.memory_space<vmem>>, vector<8x1xf32>
    %cst_7 = arith.constant dense<0.000000e+00> : vector<32x8xf32>
    %5 = tpu.matmul %3, %4, %cst_7 {dimension_numbers = #tpu.dot_dimension_numbers<[1], [1], [0], [0], [0, 0, 1, 0], [], []>} : vector<32x1xf32>, vector<8x1xf32>, vector<32x8xf32> -> vector<32x8xf32>
    %c0_8 = arith.constant 0 : index
    %c0_9 = arith.constant 0 : index
    %6 = vector.load %arg5[%c0_8, %c0_9] : memref<32x4xf32, #tpu.memory_space<vmem>>, vector<32x1xf32>
    %7 = vector.broadcast %6 : vector<32x1xf32> to vector<32x8xf32>
    %8 = arith.addf %2, %7 : vector<32x8xf32>
    %cst_10 = arith.constant 0.000000e+00 : f32
    %9 = vector.broadcast %cst_10 : f32 to vector<32x8xf32>
    %10 = arith.maximumf %8, %9 : vector<32x8xf32>
    %c0_11 = arith.constant 0 : index
    %c1 = arith.constant 1 : index
    %11 = vector.load %arg5[%c0_11, %c1] : memref<32x4xf32, #tpu.memory_space<vmem>>, vector<32x1xf32>
    %12 = vector.broadcast %11 : vector<32x1xf32> to vector<32x8xf32>
    %13 = arith.addf %5, %12 : vector<32x8xf32>
    %cst_12 = arith.constant 0.000000e+00 : f32
    %14 = vector.broadcast %cst_12 : f32 to vector<32x8xf32>
    %15 = arith.maximumf %13, %14 : vector<32x8xf32>
    %c0_13 = arith.constant 0 : index
    %c2 = arith.constant 2 : index
    %16 = vector.load %arg5[%c0_13, %c2] : memref<32x4xf32, #tpu.memory_space<vmem>>, vector<32x1xf32>
    %17 = vector.broadcast %16 : vector<32x1xf32> to vector<32x8xf32>
    %18 = arith.mulf %10, %17 : vector<32x8xf32>
    %c0_14 = arith.constant 0 : index
    %c3 = arith.constant 3 : index
    %19 = vector.load %arg5[%c0_14, %c3] : memref<32x4xf32, #tpu.memory_space<vmem>>, vector<32x1xf32>
    %20 = vector.broadcast %19 : vector<32x1xf32> to vector<32x8xf32>
    %21 = arith.mulf %15, %20 : vector<32x8xf32>
    %22 = arith.addf %18, %21 : vector<32x8xf32>
    %cst_15 = arith.constant dense<0.000000e+00> : vector<8xf32>
    %23 = vector.multi_reduction <add>, %22, %cst_15 [0] : vector<32x8xf32> to vector<8xf32>
    %24 = vector.shape_cast %23 : vector<8xf32> to vector<1x8xf32>
    %c0_16 = arith.constant 0 : index
    %25 = memref.load %arg6[%c0_16] : memref<1xf32, #tpu.memory_space<smem>>
    %26 = vector.broadcast %25 : f32 to vector<1x8xf32>
    %27 = arith.addf %24, %26 : vector<1x8xf32>
    %c0_17 = arith.constant 0 : index
    %c0_18 = arith.constant 0 : index
    %28 = vector.load %arg7[%c0_17, %c0_18] : memref<1x8xf32, #tpu.memory_space<vmem>>, vector<1x8xf32>
    tpu.vector_store %arg7[%c0_17, %c0_18], %27 {strides = array<i32>} : memref<1x8xf32, #tpu.memory_space<vmem>>, vector<1x8xf32>,
    return
  }
  func.func @transform_0(%arg0: i32) -> (i32, i32) {
    %c0_i32 = arith.constant 0 : i32
    %c0_i32_0 = arith.constant 0 : i32
    return %arg0, %c0_i32 : i32, i32
  }
  func.func @transform_1(%arg0: i32) -> (i32, i32) {
    %c0_i32 = arith.constant 0 : i32
    %c0_i32_0 = arith.constant 0 : i32
    return %arg0, %c0_i32 : i32, i32
  }
  func.func @transform_2(%arg0: i32) -> (i32, i32) {
    %c0_i32 = arith.constant 0 : i32
    %c0_i32_0 = arith.constant 0 : i32
    %c0_i32_1 = arith.constant 0 : i32
    return %c0_i32, %c0_i32_0 : i32, i32
  }
  func.func @transform_3(%arg0: i32) -> (i32, i32) {
    %c0_i32 = arith.constant 0 : i32
    %c0_i32_0 = arith.constant 0 : i32
    %c0_i32_1 = arith.constant 0 : i32
    return %c0_i32, %c0_i32_0 : i32, i32
  }
  func.func @transform_4(%arg0: i32) -> (i32, i32) {
    %c0_i32 = arith.constant 0 : i32
    %c0_i32_0 = arith.constant 0 : i32
    %c0_i32_1 = arith.constant 0 : i32
    return %c0_i32, %c0_i32_0 : i32, i32
  }
  func.func @transform_5(%arg0: i32) -> i32 {
    %c0_i32 = arith.constant 0 : i32
    %c0_i32_0 = arith.constant 0 : i32
    return %c0_i32 : i32
  }
  func.func @transform_6(%arg0: i32) -> (i32, i32) {
    %c0_i32 = arith.constant 0 : i32
    %c0_i32_0 = arith.constant 0 : i32
    return %c0_i32, %arg0 : i32, i32
  }
}

</mosaic_0001>

<bundles_post_ra>
// kernel: tpu_custom_call.1
= control target key start
LH: loop header
LB: loop body
LE: loop exit
PB: predicated region body
PF: predicated region fallthrough
CT: control target
= control target key end

     0   :  { %vm59_vm0 = vcmask 15360   ;;  %vm124_vm1 = vcmask 7168   ;;  %v304_v2 = vmov 0   ;;  %s404_s0 = inlined_call_operand.vmem [shape: f32[8,2], index: 0, kind: input, shape index: {}]   ;;  %s405_s1 = inlined_call_operand.vmem [shape: f32[8,1], index: 1, kind: input, shape index: {}]   ;;  %s406_s2 = inlined_call_operand.vmem [shape: f32[32,2], index: 2, kind: input, shape index: {}]   ;;  %s407_s3 = inlined_call_operand.vmem [shape: f32[32,1], index: 3, kind: input, shape index: {}]   ;;  %s408_s4 = inlined_call_operand.vmem [shape: f32[32,4], index: 4, kind: input, shape index: {}]   ;;  %s409_s5 = inlined_call_operand.<no memory space> [shape: f32[1], index: 5, kind: input, shape index: {}]   ;;  %s410_s6 = inlined_call_operand.hbm [shape: f32[1,8], index: 6, kind: output, shape index: {}]  }
   0x1   :  { %v29_v0 = vld [vmem:[%s404_s0] sm:$0xff]  ;;  %270 = vset.pattern.permute.xlu1 %v304_v2  ;;  %269 = vset.pattern.permute.xlu0 %v304_v2  ;;  %v37_v3 = vld [vmem:[%s408_s4 + $0x10] sm:$0xff] }
   0x2   :  { %v34_v1 = vld [vmem:[%s405_s1] sm:$0xff]  ;;  %252 = vmatpush.xpose.msk.msra.mxu0 %vm59_vm0, %v29_v0  ;;  %262 = vmatpush.xpose.msk.msra.mxu2 %vm59_vm0, %v29_v0  ;;  %v27_v6 = vld [vmem:[%s406_s2 + $0x10] sm:$0xff] }
   0x3   :  { %v35_v4 = vld [vmem:[%s408_s4] sm:$0xff]  ;;  %257 = vmatpush.xpose.msk.msra.mxu1 %vm124_vm1, %v34_v1  ;;  %263 = vmatpush.xpose.msk.msra.mxu3 %vm124_vm1, %v34_v1  ;;  %v32_v8 = vld [vmem:[%s407_s3 + $0x10] sm:$0xff] }
   0x4   :  { %v25_v5 = vld [vmem:[%s406_s2] sm:$0xff]  ;;  %51 = vperm.xlu1 %270, %v37_v3   ;;  %41 = vperm.xlu0 %269, %v35_v4  }
   0x5   :  { %v30_v7 = vld [vmem:[%s407_s3] sm:$0xff] }
   0x6   :  { %12 = vsyncpa [#allocation4], 0  ;;  %253 = vmatmul.msk.f32.vlgmr.msra.gmra.mxu0 %vm59_vm0, %v25_v5  ;;  %255 = vmatmul.msk.f32.vlgmr.msra.gmra.mxu2 %vm59_vm0, %v27_v6  ;;  %v305_v9 = vmov 1   ;;  %v38_v10 = vld [vmem:[%s408_s4 + $0x18] sm:$0xff]  ;;  %v36_v11 = vld [vmem:[%s408_s4 + $0x8] sm:$0xff]  ;;  %v306_v16 = vmov 2  }
   0x7   :  { %258 = vmatmul.msk.f32.vlgmr.msra.gmra.mxu1 %vm124_vm1, %v30_v7  ;;  %260 = vmatmul.msk.f32.vlgmr.msra.gmra.mxu3 %vm124_vm1, %v32_v8  ;;  %v26_v12 = vld [vmem:[%s406_s2 + $0x8] sm:$0xff]  ;;  %v28_v13 = vld [vmem:[%s406_s2 + $0x18] sm:$0xff]  ;;  %v307_v17 = vmov 3   ;;  %vm217_vm2 = vcmask 64512   ;;  %s308_s4 = smov [#allocation3]   ;;  %s243_s26 = sshll.u32 %s410_s6, 4  ;;  %s244_s26 = int_to_ptr.hbm [resolvable:$true] %s243_s26 }
   0x8   :  { %271 = vset.pattern.permute.xlu2 %v305_v9  ;;  %v31_v14 = vld [vmem:[%s407_s3 + $0x8] sm:$0xff]  ;;  %v33_v15 = vld [vmem:[%s407_s3 + $0x18] sm:$0xff]  ;;  %s241_s23 = sshll.u32 %s308_s4, 4  ;;  %vm234_vm3 = vcmask 57344   ;;  %s242_s23 = int_to_ptr.vmem [resolvable:$true] %s241_s23 }
   0x9   :  { %109 = vperm.xlu2 %271, %v35_v4  }
   0xc   :  { %56 = vperm.xlu1 %270, %v38_v10   ;;  %46 = vperm.xlu0 %269, %v36_v11  }
   0xe   :  { %254 = vmatmul.msk.f32.gmra.mxu0 %vm59_vm0, %v26_v12  ;;  %256 = vmatmul.msk.f32.gmra.mxu2 %vm59_vm0, %v28_v13 }
   0xf   :  { %259 = vmatmul.msk.f32.gmra.mxu1 %vm124_vm1, %v31_v14  ;;  %261 = vmatmul.msk.f32.gmra.mxu3 %vm124_vm1, %v33_v15 }
  0x11   :  { %113 = vperm.xlu2 %271, %v36_v11  }
  0x14   :  { %273 = vset.pattern.permute.xlu1 %v305_v9  ;;  %272 = vset.pattern.permute.xlu0 %v305_v9 }
  0x15   :  { %121 = vperm.xlu1 %273, %v38_v10   ;;  %117 = vperm.xlu0 %272, %v37_v3  }
  0x19   :  { %274 = vset.pattern.permute.xlu2 %v306_v16 }
  0x1a   :  { %174 = vperm.xlu2 %274, %v35_v4  }
  0x1d   :  { %275 = vset.pattern.permute.xlu1 %v306_v16  ;;  %277 = vset.pattern.permute.xlu0 %v307_v17 }
  0x1e   :  { %178 = vperm.xlu1 %275, %v36_v11   ;;  %198 = vperm.xlu0 %277, %v36_v11  }
  0x22   :  { %276 = vset.pattern.permute.xlu2 %v307_v17 }
  0x23   :  { %194 = vperm.xlu2 %276, %v35_v4  }
  0x26   :  { %182 = vperm.xlu1 %275, %v37_v3  }
  0x2b   :  { %202 = vperm.xlu2 %276, %v37_v3  }
  0x2e   :  { %186 = vperm.xlu1 %275, %v38_v10  }
  0x33   :  { %206 = vperm.xlu2 %276, %v38_v10  }
  0x63   :  { %v110_v18 = vpop.permute.xlu2 %109 }
  0x6b   :  { %v114_v21 = vpop.permute.xlu2 %113 }
  0x74   :  { %v175_v24 = vpop.permute.xlu2 %174 }
  0x76   :  { %v52_v19 = vpop.permute.xlu1 %51  ;;  %v42_v20 = vpop.permute.xlu0 %41 }
  0x7d   :  { %v195_v29 = vpop.permute.xlu2 %194 }
  0x7e   :  { %v57_v22 = vpop.permute.xlu1 %56  ;;  %v47_v23 = vpop.permute.xlu0 %46 }
  0x83   :  { %v92_v25 = vpop.f32.mrf.mxu0 }
  0x84   :  { %v157_v26 = vpop.f32.mrf.mxu1  ;;  %v93_v37 = vadd.f32 %v92_v25, %v42_v20 }
  0x85   :  { %v158_v38 = vadd.f32 %v157_v26, %v110_v18  ;;  %v203_v46 = vpop.permute.xlu2 %202  ;;  %v232_v18 = vstv %s409_s5 }
  0x86   :  { %v104_v44 = vmax.f32 %v93_v37, 0.0 }
  0x87   :  { %v122_v27 = vpop.permute.xlu1 %121  ;;  %v118_v28 = vpop.permute.xlu0 %117  ;;  %v169_v45 = vmax.f32 %v158_v38, 0.0 }
  0x88   :  { %v189_v54 = vmul.f32 %v175_v24, %v104_v44 }
  0x89   :  { %v98_v33 = vpop.f32.mrf.mxu2  ;;  %v209_v55 = vmul.f32 %v195_v29, %v169_v45 }
  0x8a   :  { %v163_v30 = vpop.f32.mrf.mxu3  ;;  %v99_v39 = vadd.f32 %v98_v33, %v52_v19 }
  0x8b   :  { %v95_v31 = vpop.f32.mrf.mxu0  ;;  %v164_v40 = vadd.f32 %v163_v30, %v118_v28  ;;  %v213_v61 = vadd.f32 %v209_v55, %v189_v54 }
  0x8c   :  { %v160_v32 = vpop.f32.mrf.mxu1  ;;  %v96_v34 = vadd.f32 %v95_v31, %v47_v23  ;;  %v106_v48 = vmax.f32 %v99_v39, 0.0 }
  0x8d   :  { %v161_v35 = vadd.f32 %v160_v32, %v114_v21  ;;  %v171_v49 = vmax.f32 %v164_v40, 0.0  ;;  %v207_v2 = vpop.permute.xlu2 %206  ;;  %v218_v4 = vsel %vm217_vm2, %v213_v61, 0.0 }
  0x8e   :  { %v105_v41 = vmax.f32 %v96_v34, 0.0 }
  0x8f   :  { %v170_v42 = vmax.f32 %v161_v35, 0.0  ;;  %v211_v58 = vmul.f32 %v203_v46, %v171_v49 }
  0x90   :  { %v179_v36 = vpop.permute.xlu1 %178  ;;  %v199_v43 = vpop.permute.xlu0 %198 }
  0x91   :  { %v190_v50 = vmul.f32 %v179_v36, %v105_v41  ;;  %v210_v51 = vmul.f32 %v199_v43, %v170_v42  ;;  %v101_v52 = vpop.f32.mrf.mxu2 }
  0x92   :  { %v166_v47 = vpop.f32.mrf.mxu3  ;;  %v102_v60 = vadd.f32 %v101_v52, %v57_v22 }
  0x93   :  { %v167_v56 = vadd.f32 %v166_v47, %v122_v27  ;;  %v214_v59 = vadd.f32 %v210_v51, %v190_v50 }
  0x94   :  { %v107_v1 = vmax.f32 %v102_v60, 0.0 }
  0x95   :  { %v172_v62 = vmax.f32 %v167_v56, 0.0  ;;  %v219_v0 = vsel %vm217_vm2, %v214_v59, 0.0 }
  0x96   :  { %v220_v8 = vadd.f32 %v219_v0, %v218_v4 }
  0x97   :  { %v212_v5 = vmul.f32 %v207_v2, %v172_v62 }
  0x98   :  { %v183_v53 = vpop.permute.xlu1 %182 }
  0x99   :  { %v191_v57 = vmul.f32 %v183_v53, %v106_v48 }
  0x9b   :  { %v215_v63 = vadd.f32 %v211_v58, %v191_v57 }
  0x9d   :  { %v221_v6 = vsel %vm217_vm2, %v215_v63, 0.0 }
  0x9e   :  { %v222_v10 = vadd.f32 %v221_v6, %v220_v8 }
  0xa0   :  { %v187_v3 = vpop.permute.xlu1 %186 }
  0xa1   :  { %v192_v7 = vmul.f32 %v187_v3, %v107_v1 }
  0xa3   :  { %v216_v9 = vadd.f32 %v212_v5, %v192_v7 }
  0xa5   :  { %v223_v11 = vsel %vm217_vm2, %v216_v9, 0.0 }
  0xa6   :  { %v224_v12 = vadd.f32 %v223_v11, %v222_v10 }
  0xa8   :  { %v225_v13 = vrot.slane %v224_v12, 4 }
  0xaa   :  { %v226_v14 = vadd.f32 %v225_v13, %v224_v12 }
  0xac   :  { %v227_v15 = vrot.slane %v226_v14, 2 }
  0xae   :  { %v228_v16 = vadd.f32 %v227_v15, %v226_v14 }
  0xb0   :  { %v229_v17 = vrot.slane %v228_v16, 1 }
  0xb2   :  { %v230_v19 = vadd.f32 %v229_v17, %v228_v16 }
  0xb4   :  { %v233_v20 = vadd.f32 %v232_v18, %v230_v19 }
  0xb6   :  { %235 = vst.msk [vmem:[#allocation3] sm:$0x1] %vm234_vm3, %v233_v20 }
  0xb7   :  { %246 = dma.vmem_to_hbm [thread:$0]  %s242_s23, 16, %s244_s26, [#allocation4]  }
  0xb8   :  { %302 = dma.done.wait [#allocation4], 16  }
  0xb9   :  { %303 = vsyncadd [#allocation4], 4294967280 }
  0xba   :  { %251 = vsyncpa [#allocation4], 1 }

</bundles_post_ra>
